<compile_context>
chip_gen: v7x
topology: tpu7x:2x2x1
jax: 0.10.0
libtpu: 0.0.40
codegen_flags: <defaults>
</compile_context>

<pallas_src>
import functools

import jax
import jax.numpy as jnp
from jax.experimental import pallas as pl
from jax.experimental.pallas import tpu as pltpu


def _round_up(x, m):
    return (x + m - 1) // m * m


def _qfl_elementwise(pred, label, score, beta):
    """Per-element QFL loss on one tile.

    pred:  (T, C) float32 logits
    label: (T, 1) int32 category labels (label >= C or < 0 means background)
    score: (T, 1) float32 quality (IoU) targets
    """
    t, c = pred.shape

    abs_x = jnp.abs(pred)
    e = jnp.exp(-abs_x)                      # exp(-|x|): shared by log1p + sigmoid
    log1p_e = jnp.log1p(e)
    relu_x = jnp.maximum(pred, 0.0)
    bce_zero = relu_x + log1p_e              # BCE-with-logits vs target 0
    inv = 1.0 / (1.0 + e)
    sig = jnp.where(pred >= 0.0, inv, e * inv)   # sigmoid(pred), no extra exp

    if float(beta) == 2.0:
        mod_bg = sig * sig                   # VALU squares, not pow -> exp/log
        diff = score - sig                   # even power: abs not needed
        mod_pos = diff * diff
    else:
        mod_bg = jnp.power(sig, beta)                       # sig >= 0
        mod_pos = jnp.power(jnp.abs(score - sig), beta)

    loss_bg = bce_zero * mod_bg
    bce_pos = bce_zero - pred * score        # BCE-with-logits vs target = score
    loss_pos = bce_pos * mod_pos

    col = jax.lax.broadcasted_iota(jnp.int32, (t, c), 1)
    is_pos = (label >= 0) & (label < c) & (col == label)
    return jnp.where(is_pos, loss_pos, loss_bg)


def _qfl_partial_sum_kernel(pred_ref, label_ref, score_ref, out_ref, *,
                            beta, n_valid, need_mask):
    """One partial sum (over all classes and all valid rows of this tile)."""
    pred = pred_ref[...].astype(jnp.float32)
    label = label_ref[...]
    score = score_ref[...].astype(jnp.float32)

    loss = _qfl_elementwise(pred, label, score, beta)       # (T, C)
    if need_mask:
        t = loss.shape[0]
        row = pl.program_id(0) * t + jax.lax.broadcasted_iota(jnp.int32, (t, 1), 0)
        loss = jnp.where(row < n_valid, loss, 0.0)
    out_ref[...] = jnp.sum(loss, keepdims=True)              # (1, 1)


def _qfl_persample_kernel(pred_ref, label_ref, score_ref, out_ref, *, beta):
    """Per-sample loss (sum over classes) for reduction='none'."""
    pred = pred_ref[...].astype(jnp.float32)
    label = label_ref[...]
    score = score_ref[...].astype(jnp.float32)

    loss = _qfl_elementwise(pred, label, score, beta)        # (T, C)
    out_ref[...] = jnp.sum(loss, axis=1, keepdims=True)      # (T, 1)


def quality_focal_loss_pallas(pred, label, score, *, beta=2.0,
                              loss_weight=1.0, reduction="mean"):
    """Pallas implementation of QualityFocalLoss.forward (weight/avg_factor = None)."""
    if reduction not in ("none", "mean", "sum"):
        raise ValueError(f"bad reduction {reduction}")

    n, c = pred.shape

    # Tile size: multiple of 8 sublanes; big enough to amortize per-step
    # overhead, small enough to fit comfortably in scoped VMEM on all chips
    # (2x double-buffered pred tiles + ~6 f32 temporaries per tile).
    tile_n = min(1024, _round_up(n, 8))
    n_pad = _round_up(n, tile_n)
    num_tiles = n_pad // tile_n
    need_mask = n_pad != n

    if need_mask:
        pad = n_pad - n
        pred = jnp.pad(pred, ((0, pad), (0, 0)))
        label = jnp.pad(label, (0, pad), constant_values=c)   # pad as background
        score = jnp.pad(score, (0, pad))

    label2d = label.reshape(n_pad, 1).astype(jnp.int32)
    score2d = score.reshape(n_pad, 1).astype(jnp.float32)
    # NOTE: pred is passed in its native dtype (bf16 stays bf16 in HBM);
    # the f32 cast happens inside the kernel on the VMEM tile.

    in_specs = [
        pl.BlockSpec((tile_n, c), lambda i: (i, 0)),
        pl.BlockSpec((tile_n, 1), lambda i: (i, 0)),
        pl.BlockSpec((tile_n, 1), lambda i: (i, 0)),
    ]
    compiler_params = pltpu.CompilerParams(dimension_semantics=("parallel",))

    if reduction == "none":
        # TODO(synk): for very small C (<<128) a transposed (C, TILE_N) layout
        # would be lane-dense; kept (N, C) layout since the API returns (N,).
        per_sample = pl.pallas_call(
            functools.partial(_qfl_persample_kernel, beta=beta),
            out_shape=jax.ShapeDtypeStruct((n_pad, 1), jnp.float32),
            grid=(num_tiles,),
            in_specs=in_specs,
            out_specs=pl.BlockSpec((tile_n, 1), lambda i: (i, 0)),
            compiler_params=compiler_params,
        )(pred, label2d, score2d)
        return loss_weight * per_sample[:n, 0]

    # 'mean' / 'sum': reduce each tile to a scalar partial sum inside the
    # kernel; only num_tiles floats ever go back to HBM.
    partials = pl.pallas_call(
        functools.partial(_qfl_partial_sum_kernel, beta=beta,
                          n_valid=n, need_mask=need_mask),
        out_shape=jax.ShapeDtypeStruct((num_tiles, 1), jnp.float32),
        grid=(num_tiles,),
        in_specs=in_specs,
        out_specs=pl.BlockSpec((1, 1), lambda i: (i, 0)),
        compiler_params=compiler_params,
    )(pred, label2d, score2d)

    total = jnp.sum(partials)
    if reduction == "mean":
        total = total / n
    return loss_weight * total


def _qfl_reference(pred, label, score, beta=2.0, loss_weight=1.0, reduction="mean"):
    """Pure-JAX reference mirroring the PyTorch code."""
    pred = pred.astype(jnp.float32)
    n, c = pred.shape
    sig = jax.nn.sigmoid(pred)
    bce0 = jnp.maximum(pred, 0.0) + jnp.log1p(jnp.exp(-jnp.abs(pred)))
    loss = bce0 * sig ** beta
    col = jnp.arange(c)[None, :]
    is_pos = (label[:, None] >= 0) & (label[:, None] < c) & (col == label[:, None])
    bce_pos = (jnp.maximum(pred, 0.0) - pred * score[:, None]
               + jnp.log1p(jnp.exp(-jnp.abs(pred))))
    loss_pos = bce_pos * jnp.abs(score[:, None] - sig) ** beta
    loss = jnp.where(is_pos, loss_pos, loss).sum(axis=1)
    if reduction == "mean":
        loss = loss.mean()
    elif reduction == "sum":
        loss = loss.sum()
    return loss_weight * loss


if __name__ == "__main__":
    key = jax.random.PRNGKey(0)
    k1, k2, k3 = jax.random.split(key, 3)

    N, C = 100, 8  # N predictions (anchors), C classes; N not a tile multiple on purpose
    pred = jax.random.normal(k1, (N, C), dtype=jnp.float32) * 2.0
    # labels in [0, C]; value == C means background (no positive assignment)
    label = jax.random.randint(k2, (N,), 0, C + 1, dtype=jnp.int32)
    score = jax.random.uniform(k3, (N,), dtype=jnp.float32)

    ok = True
    for reduction in ("mean", "sum", "none"):
        out = quality_focal_loss_pallas(pred, label, score, beta=2.0,
                                        loss_weight=1.0, reduction=reduction)
        out = jax.block_until_ready(out)
        ref = _qfl_reference(pred, label, score, beta=2.0,
                             loss_weight=1.0, reduction=reduction)
        ok = ok and bool(jnp.allclose(out, ref, rtol=1e-5, atol=1e-5))
        assert ok, (reduction, out, ref)

    print("KERNEL_OK")
</pallas_src>

<mosaic_0001>
module attributes {stable_mosaic.version = 11 : i64} {
  func.func @_qfl_partial_sum_kernel(%arg0: i32, %arg1: memref<104x8xf32, #tpu.memory_space<vmem>>, %arg2: memref<104x1xi32, #tpu.memory_space<vmem>>, %arg3: memref<104x1xf32, #tpu.memory_space<vmem>>, %arg4: memref<1x1xf32, #tpu.memory_space<vmem>>) attributes {dimension_semantics = [#tpu.dimension_semantics<parallel>], iteration_bounds = array<i64: 1>, scalar_prefetch = 0 : i64, scratch_operands = 0 : i64, tpu.core_type = #tpu.core_type<tc>, window_params = [{transform_indices = @transform_0, window_bounds = array<i64: 104, 8>}, {transform_indices = @transform_1, window_bounds = array<i64: 104, 1>}, {transform_indices = @transform_2, window_bounds = array<i64: 104, 1>}, {transform_indices = @transform_3, window_bounds = array<i64: 1, 1>}]} {
    %c0 = arith.constant 0 : index
    %c0_0 = arith.constant 0 : index
    %0 = vector.load %arg1[%c0, %c0_0] : memref<104x8xf32, #tpu.memory_space<vmem>>, vector<104x8xf32>
    %c0_1 = arith.constant 0 : index
    %c0_2 = arith.constant 0 : index
    %1 = vector.load %arg2[%c0_1, %c0_2] : memref<104x1xi32, #tpu.memory_space<vmem>>, vector<104x1xi32>
    %c0_3 = arith.constant 0 : index
    %c0_4 = arith.constant 0 : index
    %2 = vector.load %arg3[%c0_3, %c0_4] : memref<104x1xf32, #tpu.memory_space<vmem>>, vector<104x1xf32>
    %3 = math.absf %0 : vector<104x8xf32>
    %cst = arith.constant 0.000000e+00 : f32
    %4 = vector.broadcast %cst : f32 to vector<104x8xf32>
    %5 = arith.subf %4, %3 : vector<104x8xf32>
    %6 = math.exp %5 : vector<104x8xf32>
    %7 = math.log1p %6 : vector<104x8xf32>
    %cst_5 = arith.constant 0.000000e+00 : f32
    %8 = vector.broadcast %cst_5 : f32 to vector<104x8xf32>
    %9 = arith.maximumf %0, %8 : vector<104x8xf32>
    %10 = arith.addf %9, %7 : vector<104x8xf32>
    %cst_6 = arith.constant 1.000000e+00 : f32
    %11 = vector.broadcast %cst_6 : f32 to vector<104x8xf32>
    %12 = arith.addf %11, %6 : vector<104x8xf32>
    %cst_7 = arith.constant 1.000000e+00 : f32
    %13 = vector.broadcast %cst_7 : f32 to vector<104x8xf32>
    %14 = arith.divf %13, %12 : vector<104x8xf32>
    %cst_8 = arith.constant 0.000000e+00 : f32
    %15 = vector.broadcast %cst_8 : f32 to vector<104x8xf32>
    %16 = arith.cmpf oge, %0, %15 : vector<104x8xf32>
    %17 = arith.mulf %6, %14 : vector<104x8xf32>
    %18 = arith.select %16, %14, %17 : vector<104x8xi1>, vector<104x8xf32>
    %19 = arith.mulf %18, %18 : vector<104x8xf32>
    %20 = vector.broadcast %2 : vector<104x1xf32> to vector<104x8xf32>
    %21 = arith.subf %20, %18 : vector<104x8xf32>
    %22 = arith.mulf %21, %21 : vector<104x8xf32>
    %23 = arith.mulf %10, %19 : vector<104x8xf32>
    %24 = vector.broadcast %2 : vector<104x1xf32> to vector<104x8xf32>
    %25 = arith.mulf %0, %24 : vector<104x8xf32>
    %26 = arith.subf %10, %25 : vector<104x8xf32>
    %27 = arith.mulf %26, %22 : vector<104x8xf32>
    %28 = tpu.iota {dimensions = array<i32: 1>} : vector<104x8xi32>
    %c0_i32 = arith.constant 0 : i32
    %29 = vector.broadcast %c0_i32 : i32 to vector<104x1xi32>
    %30 = arith.cmpi sge, %1, %29 : vector<104x1xi32>
    %c8_i32 = arith.constant 8 : i32
    %31 = vector.broadcast %c8_i32 : i32 to vector<104x1xi32>
    %32 = arith.cmpi slt, %1, %31 : vector<104x1xi32>
    %33 = arith.andi %30, %32 : vector<104x1xi1>
    %34 = vector.broadcast %1 : vector<104x1xi32> to vector<104x8xi32>
    %35 = arith.cmpi eq, %28, %34 : vector<104x8xi32>
    %36 = vector.broadcast %33 : vector<104x1xi1> to vector<104x8xi1>
    %37 = arith.andi %36, %35 : vector<104x8xi1>
    %38 = arith.select %37, %27, %23 : vector<104x8xi1>, vector<104x8xf32>
    %c104_i32 = arith.constant 104 : i32
    %39 = arith.muli %arg0, %c104_i32 : i32
    %40 = tpu.iota {dimensions = array<i32: 0>} : vector<104x1xi32>
    %41 = vector.broadcast %39 : i32 to vector<104x1xi32>
    %42 = arith.addi %41, %40 : vector<104x1xi32>
    %c100_i32 = arith.constant 100 : i32
    %43 = vector.broadcast %c100_i32 : i32 to vector<104x1xi32>
    %44 = arith.cmpi slt, %42, %43 : vector<104x1xi32>
    %cst_9 = arith.constant 0.000000e+00 : f32
    %45 = vector.shape_cast %44 : vector<104x1xi1> to vector<104x1xi1>
    %46 = vector.broadcast %45 : vector<104x1xi1> to vector<104x8xi1>
    %47 = vector.broadcast %cst_9 : f32 to vector<104x8xf32>
    %48 = arith.select %46, %38, %47 : vector<104x8xi1>, vector<104x8xf32>
    %49 = vector.shape_cast %48 : vector<104x8xf32> to vector<1x104x8xf32>
    %cst_10 = arith.constant dense<0.000000e+00> : vector<1xf32>
    %50 = vector.multi_reduction <add>, %49, %cst_10 [1, 2] : vector<1x104x8xf32> to vector<1xf32>
    %51 = vector.shape_cast %50 : vector<1xf32> to vector<1x1x1xf32>
    %52 = vector.extract %51[0, 0, 0] : f32 from vector<1x1x1xf32>
    %53 = vector.broadcast %52 : f32 to vector<1x1xf32>
    %c0_11 = arith.constant 0 : index
    %c0_12 = arith.constant 0 : index
    %54 = vector.load %arg4[%c0_11, %c0_12] : memref<1x1xf32, #tpu.memory_space<vmem>>, vector<1x1xf32>
    tpu.vector_store %arg4[%c0_11, %c0_12], %53 {strides = array<i32>} : memref<1x1xf32, #tpu.memory_space<vmem>>, vector<1x1xf32>,
    return
  }
  func.func @transform_0(%arg0: i32) -> (i32, i32) {
    %c0_i32 = arith.constant 0 : i32
    %c0_i32_0 = arith.constant 0 : i32
    return %arg0, %c0_i32 : i32, i32
  }
  func.func @transform_1(%arg0: i32) -> (i32, i32) {
    %c0_i32 = arith.constant 0 : i32
    %c0_i32_0 = arith.constant 0 : i32
    return %arg0, %c0_i32 : i32, i32
  }
  func.func @transform_2(%arg0: i32) -> (i32, i32) {
    %c0_i32 = arith.constant 0 : i32
    %c0_i32_0 = arith.constant 0 : i32
    return %arg0, %c0_i32 : i32, i32
  }
  func.func @transform_3(%arg0: i32) -> (i32, i32) {
    %c0_i32 = arith.constant 0 : i32
    %c0_i32_0 = arith.constant 0 : i32
    return %arg0, %c0_i32 : i32, i32
  }
}

</mosaic_0001>

<bundles_post_ra>
// kernel: tpu_custom_call.1
= control target key start
LH: loop header
LB: loop body
LE: loop exit
PB: predicated region body
PF: predicated region fallthrough
CT: control target
= control target key end

     0   :  { %v908_v2 = vmov 0   ;;  %s1728_s0 = inlined_call_operand.vmem [shape: f32[104,8], index: 0, kind: input, shape index: {}]   ;;  %s1729_s1 = inlined_call_operand.vmem [shape: s32[104,1], index: 1, kind: input, shape index: {}]   ;;  %s1730_s2 = inlined_call_operand.vmem [shape: f32[104,1], index: 2, kind: input, shape index: {}]   ;;  %s1731_s3 = inlined_call_operand.hbm [shape: f32[1,1], index: 3, kind: output, shape index: {}]  }
   0x1   :  { %v43_v0 = vld [vmem:[%s1730_s2 + $0x10] sm:$0xff]  ;;  %v41_v1 = vld [vmem:[%s1730_s2] sm:$0xff]  ;;  %805 = vset.pattern.permute.xlu1 %v908_v2  ;;  %804 = vset.pattern.permute.xlu0 %v908_v2  ;;  %v29_v3 = vld [vmem:[%s1729_s1 + $0x8] sm:$0xff] }
   0x2   :  { %352 = vperm.xlu1 %805, %v43_v0   ;;  %342 = vperm.xlu0 %804, %v41_v1   ;;  %v28_v4 = vld [vmem:[%s1729_s1] sm:$0xff]  ;;  %v44_v5 = vld [vmem:[%s1730_s2 + $0x18] sm:$0xff]  ;;  %v42_v6 = vld [vmem:[%s1730_s2 + $0x8] sm:$0xff]  ;;  %vm486_vm0 = vcmp.ge.s32.totalorder %v29_v3, 0  ;;  %vm499_vm1 = vcmp.lt.s32.totalorder %v29_v3, 8 }
   0x3   :  { %vm485_vm2 = vcmp.ge.s32.totalorder %v28_v4, 0  ;;  %vm498_vm3 = vcmp.lt.s32.totalorder %v28_v4, 8  ;;  %vm512_vm4 = vmand %vm486_vm0, %vm499_vm1  ;;  %v30_v7 = vld [vmem:[%s1729_s1 + $0x10] sm:$0xff]  ;;  %v31_v10 = vld [vmem:[%s1729_s1 + $0x18] sm:$0xff] }
   0x4   :  { %vm511_vm5 = vmand %vm485_vm2, %vm498_vm3  ;;  %v577_v8 = vsel %vm512_vm4, 1, %v908_v2  ;;  %vm487_vm6 = vcmp.ge.s32.totalorder %v30_v7, 0  ;;  %vm500_vm7 = vcmp.lt.s32.totalorder %v30_v7, 8  ;;  %v45_v11 = vld [vmem:[%s1730_s2 + $0x20] sm:$0xff]  ;;  %vm488_vm9 = vcmp.ge.s32.totalorder %v31_v10, 0  ;;  %v46_v12 = vld [vmem:[%s1730_s2 + $0x28] sm:$0xff] }
   0x5   :  { %v576_v9 = vsel %vm511_vm5, 1, %v908_v2  ;;  %vm513_vm8 = vmand %vm487_vm6, %vm500_vm7  ;;  %vm501_vm10 = vcmp.lt.s32.totalorder %v31_v10, 8  ;;  %v32_v14 = vld [vmem:[%s1729_s1 + $0x20] sm:$0xff] }
   0x6   :  { %357 = vperm.xlu1 %805, %v44_v5   ;;  %347 = vperm.xlu0 %804, %v42_v6   ;;  %v578_v13 = vsel %vm513_vm8, 1, %v908_v2  ;;  %vm514_vm11 = vmand %vm488_vm9, %vm501_vm10  ;;  %vm489_vm12 = vcmp.ge.s32.totalorder %v32_v14, 0  ;;  %vm502_vm13 = vcmp.lt.s32.totalorder %v32_v14, 8 }
   0x7   :  { %v579_v15 = vsel %vm514_vm11, 1, %v908_v2 }
   0xa   :  { %528 = vperm.xlu1 %805, %v29_v3   ;;  %525 = vperm.xlu0 %804, %v28_v4  }
   0xe   :  { %593 = vperm.xlu1 %805, %v577_v8   ;;  %590 = vperm.xlu0 %804, %v576_v9  }
  0x12   :  { %531 = vperm.xlu1 %805, %v30_v7   ;;  %362 = vperm.xlu0 %804, %v45_v11  }
  0x16   :  { %367 = vperm.xlu1 %805, %v46_v12   ;;  %596 = vperm.xlu0 %804, %v578_v13  }
  0x17   :  { %8 = vsyncpa [#allocation3], 0  ;;  %v33_v16 = vld [vmem:[%s1729_s1 + $0x28] sm:$0xff]  ;;  %v47_v17 = vld [vmem:[%s1730_s2 + $0x30] sm:$0xff] }
  0x18   :  { %vm515_vm14 = vmand %vm489_vm12, %vm502_vm13  ;;  %vm490_vm15 = vcmp.ge.s32.totalorder %v33_v16, 0  ;;  %vm503_vm0 = vcmp.lt.s32.totalorder %v33_v16, 8  ;;  %v48_v18 = vld [vmem:[%s1730_s2 + $0x38] sm:$0xff]  ;;  %v34_v20 = vld [vmem:[%s1729_s1 + $0x30] sm:$0xff] }
  0x19   :  { %v580_v19 = vsel %vm515_vm14, 1, %v908_v2  ;;  %vm516_vm1 = vmand %vm490_vm15, %vm503_vm0  ;;  %vm491_vm2 = vcmp.ge.s32.totalorder %v34_v20, 0  ;;  %vm504_vm3 = vcmp.lt.s32.totalorder %v34_v20, 8  ;;  %v35_v22 = vld [vmem:[%s1729_s1 + $0x38] sm:$0xff]  ;;  %v49_v23 = vld [vmem:[%s1730_s2 + $0x40] sm:$0xff] }
  0x1a   :  { %599 = vperm.xlu1 %805, %v579_v15   ;;  %534 = vperm.xlu0 %804, %v31_v10   ;;  %v581_v21 = vsel %vm516_vm1, 1, %v908_v2  ;;  %vm517_vm4 = vmand %vm491_vm2, %vm504_vm3  ;;  %vm492_vm5 = vcmp.ge.s32.totalorder %v35_v22, 0  ;;  %vm505_vm6 = vcmp.lt.s32.totalorder %v35_v22, 8  ;;  %v50_v24 = vld [vmem:[%s1730_s2 + $0x48] sm:$0xff]  ;;  %v36_v26 = vld [vmem:[%s1729_s1 + $0x40] sm:$0xff] }
  0x1b   :  { %v582_v25 = vsel %vm517_vm4, 1, %v908_v2  ;;  %vm518_vm7 = vmand %vm492_vm5, %vm505_vm6  ;;  %vm493_vm8 = vcmp.ge.s32.totalorder %v36_v26, 0  ;;  %vm506_vm9 = vcmp.lt.s32.totalorder %v36_v26, 8  ;;  %v37_v28 = vld [vmem:[%s1729_s1 + $0x48] sm:$0xff]  ;;  %v51_v29 = vld [vmem:[%s1730_s2 + $0x50] sm:$0xff] }
  0x1c   :  { %v583_v27 = vsel %vm518_vm7, 1, %v908_v2  ;;  %vm519_vm10 = vmand %vm493_vm8, %vm506_vm9  ;;  %vm494_vm11 = vcmp.ge.s32.totalorder %v37_v28, 0  ;;  %vm507_vm12 = vcmp.lt.s32.totalorder %v37_v28, 8  ;;  %v52_v30 = vld [vmem:[%s1730_s2 + $0x58] sm:$0xff]  ;;  %v38_v32 = vld [vmem:[%s1729_s1 + $0x50] sm:$0xff] }
  0x1d   :  { %v584_v31 = vsel %vm519_vm10, 1, %v908_v2  ;;  %vm520_vm13 = vmand %vm494_vm11, %vm507_vm12  ;;  %vm495_vm14 = vcmp.ge.s32.totalorder %v38_v32, 0  ;;  %vm508_vm15 = vcmp.lt.s32.totalorder %v38_v32, 8  ;;  %v39_v34 = vld [vmem:[%s1729_s1 + $0x58] sm:$0xff]  ;;  %v53_v35 = vld [vmem:[%s1730_s2 + $0x60] sm:$0xff] }
  0x1e   :  { %537 = vperm.xlu1 %805, %v32_v14   ;;  %372 = vperm.xlu0 %804, %v47_v17   ;;  %v585_v33 = vsel %vm520_vm13, 1, %v908_v2  ;;  %vm521_vm0 = vmand %vm495_vm14, %vm508_vm15  ;;  %vm496_vm1 = vcmp.ge.s32.totalorder %v39_v34, 0  ;;  %vm509_vm2 = vcmp.lt.s32.totalorder %v39_v34, 8  ;;  %v40_v36 = vld [vmem:[%s1729_s1 + $0x60] sm:$0xff]  ;;  %v1026_v40 = vld [vmem:[%s1728_s0 + $0x10] sm:$0xff] }
  0x1f   :  { %v586_v37 = vsel %vm521_vm0, 1, %v908_v2  ;;  %vm522_vm3 = vmand %vm496_vm1, %vm509_vm2  ;;  %vm497_vm4 = vcmp.ge.s32.totalorder %v40_v36, 0  ;;  %vm510_vm5 = vcmp.lt.s32.totalorder %v40_v36, 8  ;;  %v56_v41 = vand.u32 2147483647, %v1026_v40  ;;  %v1032_v42 = vld [vmem:[%s1728_s0] sm:$0xff] }
  0x20   :  { %v587_v38 = vsel %vm522_vm3, 1, %v908_v2  ;;  %vm523_vm6 = vmand %vm497_vm4, %vm510_vm5  ;;  %v1037_v43 = vld [vmem:[%s1728_s0 + $0x18] sm:$0xff]  ;;  %v54_v45 = vand.u32 2147483647, %v1032_v42  ;;  %v1043_v46 = vld [vmem:[%s1728_s0 + $0x8] sm:$0xff]  ;;  %vm290_vm8 = vcmp.ge.f32.partialorder %v1026_v40, 0.0 }
  0x21   :  { %v588_v39 = vsel %vm523_vm6, 1, %v908_v2  ;;  %v69_v44 = vsub.f32 0.0, %v56_v41  ;;  %v57_v47 = vand.u32 2147483647, %v1037_v43  ;;  %v55_v50 = vand.u32 2147483647, %v1043_v46 }
  0x22   :  { %377 = vperm.xlu1 %805, %v48_v18   ;;  %602 = vperm.xlu0 %804, %v580_v19   ;;  %v67_v49 = vsub.f32 0.0, %v54_v45  ;;  %v1050_v51 = vld [vmem:[%s1728_s0 + $0x20] sm:$0xff]  ;;  %v1055_v53 = vld [vmem:[%s1728_s0 + $0x28] sm:$0xff]  ;;  %v1061_v57 = vld [vmem:[%s1728_s0 + $0x30] sm:$0xff]  ;;  %vm288_vm9 = vcmp.ge.f32.partialorder %v1032_v42, 0.0  ;;  %vm291_vm12 = vcmp.ge.f32.partialorder %v1037_v43, 0.0 }
  0x23   :  { %v84_v48 = vmul.f32 1.442695, %v69_v44  ;;  %v70_v52 = vsub.f32 0.0, %v57_v47  ;;  %1745 = vst [vmem:[#allocation5_spill] sm:$0xff] %v1055_v53  ;;  %v68_v55 = vsub.f32 0.0, %v55_v50  ;;  %1746 = vst [vmem:[#allocation6_spill] sm:$0xff] %v1061_v57 }
  0x24   :  { %v80_v54 = vmul.f32 1.442695, %v67_v49  ;;  %v58_v56 = vand.u32 2147483647, %v1050_v51  ;;  %v1066_v58 = vld [vmem:[%s1728_s0 + $0x38] sm:$0xff]  ;;  %v1073_v62 = vld [vmem:[%s1728_s0 + $0x40] sm:$0xff] }
  0x25   :  { %806 = vpow2.f32 %v84_v48  ;;  %1747 = vst [vmem:[#allocation7_spill] sm:$0xff] %v1066_v58  ;;  %v86_v59 = vmul.f32 1.442695, %v70_v52  ;;  %v59_v60 = vand.u32 2147483647, %v1055_v53  ;;  %1748 = vst [vmem:[#allocation8_spill] sm:$0xff] %v1073_v62 }
  0x26   :  { %605 = vperm.xlu1 %805, %v581_v21   ;;  %540 = vperm.xlu0 %804, %v33_v16   ;;  %v60_v61 = vand.u32 2147483647, %v1061_v57  ;;  %808 = vpow2.f32 %v80_v54  ;;  %v82_v63 = vmul.f32 1.442695, %v68_v55  ;;  %v71_v0 = vsub.f32 0.0, %v58_v56  ;;  %v1079_v2 = vld [vmem:[%s1728_s0 + $0x48] sm:$0xff] }
  0x27   :  { %v61_v1 = vand.u32 2147483647, %v1066_v58  ;;  %810 = vpow2.f32 %v86_v59  ;;  %v72_v3 = vsub.f32 0.0, %v59_v60  ;;  %v62_v4 = vand.u32 2147483647, %v1073_v62  ;;  %v1088_v14 = vld [vmem:[%s1728_s0 + $0x50] sm:$0xff] }
  0x28   :  { %v73_v5 = vsub.f32 0.0, %v60_v61  ;;  %v63_v6 = vand.u32 2147483647, %v1079_v2  ;;  %812 = vpow2.f32 %v82_v63  ;;  %v88_v7 = vmul.f32 1.442695, %v71_v0 }
  0x29   :  { %v74_v8 = vsub.f32 0.0, %v61_v1  ;;  %v90_v10 = vmul.f32 1.442695, %v72_v3  ;;  %v75_v11 = vsub.f32 0.0, %v62_v4  ;;  %v64_v19 = vand.u32 2147483647, %v1088_v14 }
  0x2a   :  { %543 = vperm.xlu1 %805, %v34_v20   ;;  %382 = vperm.xlu0 %804, %v49_v23   ;;  %v92_v12 = vmul.f32 1.442695, %v73_v5  ;;  %v76_v13 = vsub.f32 0.0, %v63_v6  ;;  %814 = vpow2.f32 %v88_v7  ;;  %v1732_v20 = vlaneseq }
  0x2b   :  { %v94_v15 = vmul.f32 1.442695, %v74_v8  ;;  %816 = vpow2.f32 %v90_v10  ;;  %v96_v18 = vmul.f32 1.442695, %v75_v11  ;;  %vm289_vm14 = vcmp.ge.f32.partialorder %v1043_v46, 0.0 }
  0x2c   :  { %818 = vpow2.f32 %v92_v12  ;;  %v98_v21 = vmul.f32 1.442695, %v76_v13  ;;  %vm292_vm0 = vcmp.ge.f32.partialorder %v1050_v51, 0.0  ;;  %vm293_vm3 = vcmp.ge.f32.partialorder %v1055_v53, 0.0 }
  0x2d   :  { %820 = vpow2.f32 %v94_v15  ;;  %vm294_vm4 = vcmp.ge.f32.partialorder %v1061_v57, 0.0  ;;  %vm295_vm6 = vcmp.ge.f32.partialorder %v1066_v58, 0.0 }
  0x2e   :  { %387 = vperm.xlu1 %805, %v50_v24   ;;  %608 = vperm.xlu0 %804, %v582_v25   ;;  %v1100_v24 = vld [vmem:[%s1728_s0 + $0x58] sm:$0xff] }
  0x2f   :  { %v1083_v9 = vpop.eup %806 }
  0x30   :  { %v124_v16 = vadd.f32 1.0, %v1083_v9  ;;  %v1091_v17 = vpop.eup %808 }
  0x31   :  { %v106_v23 = vadd.f32 1.0, %v1091_v17  ;;  %v112_v55 = vand.u32 2147483647, %v1091_v17 }
  0x32   :  { %611 = vperm.xlu1 %805, %v583_v27   ;;  %546 = vperm.xlu0 %804, %v35_v22   ;;  %v1094_v22 = vpop.eup %810  ;;  %822 = vlog2.f32 %v124_v16  ;;  %v225_v27 = vmax.f32 %v1026_v40, 0.0 }
  0x33   :  { %v1102_v25 = vpop.eup %812  ;;  %824 = vpow2.f32 %v96_v18  ;;  %v136_v41 = vmul.f32 -0.5, %v1094_v22  ;;  %v139_v3 = vand.u32 2147483647, %v1094_v22  ;;  %vm1155_vm10 = vcmp.lt.f32.partialorder %v112_v55, 0.0004427343 }
  0x34   :  { %826 = vpow2.f32 %v98_v21  ;;  %v118_v48 = vmul.f32 -0.5, %v1102_v25  ;;  %v121_v4 = vand.u32 2147483647, %v1102_v25 }
  0x35   :  { %828 = vrcp.f32 %v124_v16  ;;  %v137_v1 = vadd.f32 1.0, %v136_v41  ;;  %vm1166_vm11 = vcmp.lt.f32.partialorder %v139_v3, 0.0004427343 }
  0x36   :  { %549 = vperm.xlu1 %805, %v36_v26   ;;  %392 = vperm.xlu0 %804, %v51_v29   ;;  %v77_v26 = vsub.f32 0.0, %v64_v19  ;;  %v1107_v29 = vand.u32 127, %v1732_v20  ;;  %830 = vlog2.f32 %v106_v23  ;;  %v119_v7 = vadd.f32 1.0, %v118_v48 }
  0x37   :  { %832 = vrcp.f32 %v106_v23  ;;  %vm1175_vm13 = vcmp.lt.f32.partialorder %v121_v4, 0.0004427343 }
  0x3a   :  { %397 = vperm.xlu1 %805, %v52_v30   ;;  %614 = vperm.xlu0 %804, %v584_v31  }
  0x3e   :  { %617 = vperm.xlu1 %805, %v585_v33   ;;  %552 = vperm.xlu0 %804, %v37_v28   ;;  %v133_v28 = vadd.f32 1.0, %v1094_v22  ;;  %v127_v33 = vmul.f32 -0.5, %v1083_v9 }
  0x40   :  { %834 = vlog2.f32 %v133_v28  ;;  %v128_v54 = vadd.f32 1.0, %v127_v33 }
  0x41   :  { %836 = vrcp.f32 %v133_v28 }
  0x42   :  { %555 = vperm.xlu1 %805, %v38_v32   ;;  %402 = vperm.xlu0 %804, %v53_v35   ;;  %v65_v32 = vand.u32 2147483647, %v1100_v24  ;;  %v129_v13 = vmul.f32 %v1083_v9, %v128_v54 }
  0x44   :  { %v1126_v50 = vsub.f32 0.0, %v65_v32  ;;  %v1164_v32 = vmul.f32 %v1094_v22, %v137_v1 }
  0x46   :  { %558 = vperm.xlu1 %805, %v39_v34   ;;  %620 = vperm.xlu0 %804, %v586_v37   ;;  %v115_v34 = vadd.f32 1.0, %v1102_v25  ;;  %v130_v37 = vand.u32 2147483647, %v1083_v9 }
  0x48   :  { %838 = vlog2.f32 %v115_v34  ;;  %vm1134_vm7 = vcmp.lt.f32.partialorder %v130_v37, 0.0004427343 }
  0x4a   :  { %561 = vperm.xlu1 %805, %v40_v36   ;;  %623 = vperm.xlu0 %804, %v587_v38   ;;  %v1115_v36 = vpop.eup %814  ;;  %v109_v38 = vmul.f32 -0.5, %v1091_v17 }
  0x4b   :  { %v1122_v47 = vpop.eup %816  ;;  %v142_v56 = vadd.f32 1.0, %v1115_v36  ;;  %v145_v63 = vmul.f32 -0.5, %v1115_v36 }
  0x4c   :  { %v1128_v52 = vpop.eup %818  ;;  %v110_v61 = vadd.f32 1.0, %v109_v38  ;;  %v151_v5 = vadd.f32 1.0, %v1122_v47  ;;  %v154_v8 = vmul.f32 -0.5, %v1122_v47  ;;  %v1173_v38 = vmul.f32 %v1102_v25, %v119_v7 }
  0x4d   :  { %v1132_v59 = vpop.eup %820  ;;  %v163_v10 = vmul.f32 -0.5, %v1128_v52  ;;  %v160_v18 = vadd.f32 1.0, %v1128_v52  ;;  %v166_v20 = vand.u32 2147483647, %v1128_v52 }
  0x4e   :  { %626 = vperm.xlu0 %804, %v588_v39   ;;  %v100_v39 = vmul.f32 1.442695, %v77_v26  ;;  %v823_v0 = vpop.eup %822  ;;  %v1161_v23 = vmul.f32 %v1091_v17, %v110_v61  ;;  %v146_v26 = vadd.f32 1.0, %v145_v63  ;;  %v155_v41 = vadd.f32 1.0, %v154_v8 }
  0x4f   :  { %v1143_v6 = vpop.eup %824  ;;  %v126_v21 = vmul.f32 0.6931472, %v823_v0  ;;  %v164_v48 = vadd.f32 1.0, %v163_v10  ;;  %v157_v63 = vand.u32 2147483647, %v1122_v47  ;;  %v169_v0 = vadd.f32 1.0, %v1132_v59 }
  0x50   :  { %840 = vpow2.f32 %v100_v39  ;;  %v1148_v11 = vpop.eup %826  ;;  %v1190_v7 = vmul.f32 %v1115_v36, %v146_v26  ;;  %v172_v60 = vmul.f32 -0.5, %v1132_v59  ;;  %v1203_v26 = vmul.f32 %v1122_v47, %v155_v41 }
  0x51   :  { %842 = vrcp.f32 %v115_v34  ;;  %v829_v19 = vpop.eup %828  ;;  %v148_v34 = vand.u32 2147483647, %v1115_v36  ;;  %v132_v3 = vsel %vm1134_vm7, %v129_v13, %v126_v21  ;;  %vm1221_vm1 = vcmp.lt.f32.partialorder %v157_v63, 0.0004427343 }
  0x52   :  { %844 = vlog2.f32 %v142_v56  ;;  %v831_v28 = vpop.eup %830  ;;  %v303_v55 = vmul.f32 %v829_v19, %v1083_v9  ;;  %vm1241_vm2 = vcmp.lt.f32.partialorder %v166_v20, 0.0004427343  ;;  %v173_v35 = vadd.f32 1.0, %v172_v60 }
  0x53   :  { %846 = vrcp.f32 %v142_v56  ;;  %v833_v37 = vpop.eup %832  ;;  %v108_v4 = vmul.f32 0.6931472, %v831_v28  ;;  %vm1193_vm15 = vcmp.lt.f32.partialorder %v148_v34, 0.0004427343  ;;  %v1211_v28 = vadd.f32 %v225_v27, %v132_v3  ;;  %v1229_v27 = vld [vmem:[%s1728_s0 + $0x60] sm:$0xff]  ;;  %s909_s0 = smov [#allocation2]  }
  0x54   :  { %848 = vlog2.f32 %v151_v5  ;;  %v835_v54 = vpop.eup %834  ;;  %v301_v8 = vmul.f32 %v833_v37, %v1091_v17  ;;  %v178_v17 = vadd.f32 1.0, %v1143_v6  ;;  %v175_v31 = vand.u32 2147483647, %v1132_v59  ;;  %s792_s7 = sshll.u32 %s909_s0, 4  ;;  %s793_s7 = int_to_ptr.vmem [resolvable:$true] %s792_s7 }
  0x55   :  { %850 = vlog2.f32 %v160_v18  ;;  %v837_v1 = vpop.eup %836  ;;  %v135_v21 = vmul.f32 0.6931472, %v835_v54  ;;  %v66_v20 = vand.u32 2147483647, %v1229_v27  ;;  %s884_s9 = scalar_lea.vmem %s793_s7, 16  ;;  %s888_s2 = scalar_lea.vmem %s793_s7, 32 }
  0x56   :  { %852 = vrcp.f32 %v151_v5  ;;  %v839_v9 = vpop.eup %838  ;;  %v1206_v5 = vmul.f32 %v1128_v52, %v164_v48  ;;  %v102_v48 = vmul.f32 1.442695, %v1126_v50  ;;  %v304_v63 = vmul.f32 %v837_v1, %v1094_v22  ;;  %p885_p0 = scmp.ne.s32.totalorder %s793_s7, %s884_s9  ;;  %p889_p1 = scmp.lt.s32.totalorder %s793_s7, %s793_s7 }
  0x57   :  { %854 = vrcp.f32 %v160_v18  ;;  %v1215_v18 = vsel %vm290_vm8, %v829_v19, %v303_v55  ;;  %v114_v55 = vsel %vm1155_vm10, %v1161_v23, %v108_v4  ;;  %v117_v49 = vmul.f32 0.6931472, %v839_v9  ;;  %p890_p2 = scmp.lt.s32.totalorder %s888_s2, %s884_s9 }
  0x58   :  { %856 = vlog2.f32 %v169_v0  ;;  %v329_v19 = vmul.f32 %v1215_v18, %v1215_v18  ;;  %v1239_v50 = vsel %vm288_vm9, %v833_v37, %v301_v8  ;;  %v141_v22 = vsel %vm1166_vm11, %v1164_v32, %v135_v21 }
  0x59   :  { %858 = vrcp.f32 %v169_v0  ;;  %v327_v16 = vmul.f32 %v1239_v50, %v1239_v50  ;;  %v1765_v37 = vmax.f32 %v1032_v42, 0.0  ;;  %v187_v32 = vadd.f32 1.0, %v1148_v11  ;;  %p891_p3 = por %p890_p2, %p889_p1 }
  0x5a   :  { %v1199_v13 = vpop.eup %840  ;;  %860 = vlog2.f32 %v178_v17  ;;  %v1266_v33 = vsel %vm291_vm12, %v837_v1, %v304_v63  ;;  %v123_v60 = vsel %vm1175_vm13, %v1173_v38, %v117_v49  ;;  %vm1284_vm5 = vcmp.lt.f32.partialorder %v175_v31, 0.0004427343 }
  0x5b   :  { %v843_v3 = vpop.eup %842  ;;  %v1255_v4 = vadd.f32 %v1765_v37, %v114_v55  ;;  %862 = vpow2.f32 %v102_v48  ;;  %v1272_v55 = vmul.f32 %v329_v19, %v1211_v28  ;;  %v1767_v37 = vmax.f32 %v1037_v43, 0.0  ;;  %p892_p4 = pnand %p891_p3, %p885_p0 }
  0x5c   :  { %v845_v45 = vpop.eup %844  ;;  %v302_v0 = vmul.f32 %v843_v3, %v1102_v25  ;;  %864 = vrcp.f32 %v178_v17  ;;  %v330_v48 = vmul.f32 %v1266_v33, %v1266_v33  ;;  %v79_v38 = vsub.f32 0.0, %v66_v20 }
  0x5d   :  { %v847_v30 = vpop.eup %846  ;;  %v144_v21 = vmul.f32 0.6931472, %v845_v45  ;;  %1766 = vst [vmem:[#allocation11_spill] sm:$0xff] %v1272_v55  ;;  %v1771_v17 = vmax.f32 %v1043_v46, 0.0  ;;  %866 = vlog2.f32 %v187_v32  ;;  %v196_v31 = vadd.f32 1.0, %v1199_v13 }
  0x5e   :  { %v849_v23 = vpop.eup %848  ;;  %v305_v1 = vmul.f32 %v847_v30, %v1115_v36  ;;  %868 = vrcp.f32 %v187_v32  ;;  %vm296_vm8 = vcmp.ge.f32.partialorder %v1073_v62, 0.0  ;;  %vm297_vm10 = vcmp.ge.f32.partialorder %v1079_v2, 0.0 }
  0x5f   :  { %v851_v25 = vpop.eup %850  ;;  %v153_v49 = vmul.f32 0.6931472, %v849_v23  ;;  %v1290_v19 = vadd.f32 %v1771_v17, %v123_v60  ;;  %v150_v20 = vsel %vm1193_vm15, %v1190_v7, %v144_v21  ;;  %v174_v60 = vmul.f32 %v1132_v59, %v173_v35 }
  0x60   :  { %v853_v63 = vpop.eup %852  ;;  %v162_v23 = vmul.f32 0.6931472, %v851_v25  ;;  %v104_v35 = vmul.f32 1.442695, %v79_v38  ;;  %v1774_v25 = vmax.f32 %v1050_v51, 0.0  ;;  %870 = vlog2.f32 %v196_v31 }
  0x61   :  { %v855_v39 = vpop.eup %854  ;;  %v306_v55 = vmul.f32 %v853_v63, %v1122_v47  ;;  %v159_v10 = vsel %vm1221_vm1, %v1203_v26, %v153_v49  ;;  %v190_v49 = vmul.f32 -0.5, %v1148_v11  ;;  %872 = vrcp.f32 %v196_v31 }
  0x62   :  { %v857_v17 = vpop.eup %856  ;;  %v307_v7 = vmul.f32 %v855_v39, %v1128_v52  ;;  %v168_v41 = vsel %vm1241_vm2, %v1206_v5, %v162_v23  ;;  %v184_v23 = vand.u32 2147483647, %v1143_v6  ;;  %874 = vpow2.f32 %v104_v35 }
  0x63   :  { %v859_v21 = vpop.eup %858  ;;  %v171_v32 = vmul.f32 0.6931472, %v857_v17  ;;  %v191_v35 = vadd.f32 1.0, %v190_v49  ;;  %vm298_vm12 = vcmp.ge.f32.partialorder %v1088_v14, 0.0  ;;  %vm748_vm13 = vcmask 64512  }
  0x64   :  { %v861_v26 = vpop.eup %860  ;;  %v1352_v5 = vsel %vm294_vm4, %v855_v39, %v307_v7  ;;  %v199_v39 = vmul.f32 -0.5, %v1199_v13  ;;  %vm1380_vm7 = vcmp.lt.f32.partialorder %v184_v23, 0.0004427343  ;;  %vm299_vm15 = vcmp.ge.f32.partialorder %v1100_v24, 0.0 }
  0x65   :  { %v1338_v38 = vpop.eup %862  ;;  %v333_v31 = vmul.f32 %v1352_v5, %v1352_v5  ;;  %v177_v7 = vsel %vm1284_vm5, %v174_v60, %v171_v32 }
  0x81   :  { %v1150_v12 = vpop.permute.xlu1 %352  ;;  %v1153_v15 = vpop.permute.xlu0 %342 }
  0x85   :  { %v1180_v56 = vpop.permute.xlu1 %357  ;;  %v1182_v61 = vpop.permute.xlu0 %347 }
  0x86   :  { %1757 = vst [vmem:[#allocation9_spill] sm:$0xff] %v1180_v56  ;;  %v1276_v56 = vadd.f32 %v1767_v37, %v141_v22  ;;  %v1294_v22 = vsel %vm289_vm14, %v843_v3, %v302_v0  ;;  %v1312_v0 = vsel %vm292_vm0, %v847_v30, %v305_v1 }
  0x87   :  { %v331_v30 = vmul.f32 %v1312_v0, %v1312_v0 }
  0x88   :  { %1768 = vst [vmem:[#allocation12_spill] sm:$0xff] %v1276_v56  ;;  %v1308_v3 = vmul.f32 %v330_v48, %v1276_v56  ;;  %v1322_v48 = vadd.f32 %v1774_v25, %v150_v20  ;;  %v1776_v20 = vmax.f32 %v1055_v53, 0.0  ;;  %v308_v53 = vmul.f32 %v859_v21, %v1132_v59 }
  0x89   :  { %v1217_v34 = vpop.permute.xlu1 %528  ;;  %v1219_v54 = vpop.permute.xlu0 %525 }
  0x8a   :  { %1760 = vst [vmem:[#allocation10_spill] sm:$0xff] %v1219_v54  ;;  %v1282_v54 = vmul.f32 %v327_v16, %v1255_v4  ;;  %v328_v16 = vmul.f32 %v1294_v22, %v1294_v22  ;;  %1773 = vst [vmem:[#allocation14_spill] sm:$0xff] %v1308_v3  ;;  %v230_v3 = vmax.f32 %v1066_v58, 0.0  ;;  %v1342_v25 = vadd.f32 %v1776_v20, %v159_v10 }
  0x8b   :  { %v1356_v17 = vmul.f32 %v331_v30, %v1322_v48  ;;  %v193_v30 = vand.u32 2147483647, %v1148_v11  ;;  %v205_v20 = vadd.f32 1.0, %v1338_v38  ;;  %v1397_v58 = vsel %vm295_vm6, %v859_v21, %v308_v53 }
  0x8c   :  { %v1332_v52 = vmul.f32 %v328_v16, %v1290_v19  ;;  %1777 = vst [vmem:[#allocation16_spill] sm:$0xff] %v1342_v25  ;;  %v865_v16 = vpop.eup %864  ;;  %v1389_v59 = vadd.f32 %v230_v3, %v177_v7  ;;  %vm564_vm0 = vcmp.eq.s32.totalorder %v1107_v29, %v1217_v34 }
  0x8d   :  { %v1258_v9 = vpop.permute.xlu1 %593  ;;  %v1260_v8 = vpop.permute.xlu0 %590  ;;  %1779 = vst [vmem:[#allocation18_spill] sm:$0xff] %v1356_v17  ;;  %876 = vlog2.f32 %v205_v20  ;;  %vm1403_vm9 = vcmp.lt.f32.partialorder %v193_v30, 0.0004427343  ;;  %v211_v30 = vand.u32 2147483647, %v1338_v38 }
  0x8e   :  { %v867_v17 = vpop.eup %866  ;;  %878 = vrcp.f32 %v205_v20  ;;  %vm629_vm14 = vcmp.eq.s32.totalorder %v1258_v9, 1  ;;  %vm628_vm1 = vcmp.eq.s32.totalorder %v1260_v8, 1  ;;  %v1796_v8 = vld [vmem:[#allocation9_spill] sm:$0xff] }
  0x8f   :  { %v869_v49 = vpop.eup %868  ;;  %v189_v23 = vmul.f32 0.6931472, %v867_v17  ;;  %vm1490_vm2 = vmand %vm629_vm14, %vm564_vm0  ;;  %vm1513_vm5 = vcmp.lt.f32.partialorder %v211_v30, 0.0004427343 }
  0x91   :  { %v1296_v36 = vpop.permute.xlu1 %531  ;;  %v1298_v37 = vpop.permute.xlu0 %362 }
  0x92   :  { %1772 = vst [vmem:[#allocation13_spill] sm:$0xff] %v1296_v36  ;;  %v181_v36 = vmul.f32 -0.5, %v1143_v6 }
  0x94   :  { %v182_v56 = vadd.f32 1.0, %v181_v36 }
  0x95   :  { %v1326_v1 = vpop.permute.xlu1 %367  ;;  %v1328_v47 = vpop.permute.xlu0 %596 }
  0x96   :  { %1775 = vst [vmem:[#allocation15_spill] sm:$0xff] %v1326_v1  ;;  %v1346_v1 = vsel %vm293_vm3, %v853_v63, %v306_v55  ;;  %v1780_v63 = vmax.f32 %v1061_v57, 0.0  ;;  %vm630_vm6 = vcmp.eq.s32.totalorder %v1328_v47, 1 }
  0x97   :  { %1778 = vst [vmem:[#allocation17_spill] sm:$0xff] %v1346_v1  ;;  %v332_v44 = vmul.f32 %v1346_v1, %v1346_v1  ;;  %v180_v1 = vmul.f32 0.6931472, %v861_v26  ;;  %v202_v26 = vand.u32 2147483647, %v1199_v13 }
  0x98   :  { %v1364_v36 = vadd.f32 %v1780_v63, %v168_v41  ;;  %v183_v41 = vmul.f32 %v1143_v6, %v182_v56  ;;  %v309_v63 = vmul.f32 %v865_v16, %v1143_v6  ;;  %v231_v56 = vmax.f32 %v1073_v62, 0.0 }
  0x99   :  { %v1358_v10 = vpop.permute.xlu1 %599  ;;  %v1360_v55 = vpop.permute.xlu0 %534  ;;  %v1377_v57 = vmul.f32 %v332_v44, %v1342_v25  ;;  %v200_v6 = vadd.f32 1.0, %v199_v39  ;;  %vm1418_vm11 = vcmp.lt.f32.partialorder %v202_v26, 0.0004427343  ;;  %v310_v62 = vmul.f32 %v869_v49, %v1148_v11 }
  0x9a   :  { %1781 = vst [vmem:[#allocation19_spill] sm:$0xff] %v1364_v36  ;;  %v1394_v44 = vmul.f32 %v333_v31, %v1364_v36  ;;  %v871_v25 = vpop.eup %870  ;;  %v186_v3 = vsel %vm1380_vm7, %v183_v41, %v180_v1  ;;  %v1401_v7 = vsel %vm296_vm8, %v865_v16, %v309_v63  ;;  %v334_v31 = vmul.f32 %v1397_v58, %v1397_v58 }
  0x9b   :  { %1782 = vst [vmem:[#allocation20_spill] sm:$0xff] %v1377_v57  ;;  %v192_v57 = vmul.f32 %v1148_v11, %v191_v35  ;;  %1786 = vst [vmem:[#allocation22_spill] sm:$0xff] %v1401_v7  ;;  %v335_v17 = vmul.f32 %v1401_v7, %v1401_v7  ;;  %v232_v35 = vmax.f32 %v1079_v2, 0.0  ;;  %v873_v53 = vpop.eup %872  ;;  %v201_v16 = vmul.f32 %v1199_v13, %v200_v6 }
  0x9c   :  { %1785 = vst [vmem:[#allocation21_spill] sm:$0xff] %v1394_v44  ;;  %v233_v41 = vmax.f32 %v1088_v14, 0.0  ;;  %v1424_v63 = vpop.eup %874  ;;  %v1426_v45 = vadd.f32 %v231_v56, %v186_v3  ;;  %v198_v7 = vmul.f32 0.6931472, %v871_v25  ;;  %v208_v6 = vmul.f32 -0.5, %v1338_v38 }
  0x9d   :  { %v1385_v60 = vpop.permute.xlu1 %537  ;;  %v1387_v32 = vpop.permute.xlu0 %372  ;;  %v195_v44 = vsel %vm1403_vm9, %v192_v57, %v189_v23  ;;  %v234_v26 = vmax.f32 %v1100_v24, 0.0  ;;  %v445_v56 = vmul.f32 %v1182_v61, %v1043_v46  ;;  %v1439_v3 = vmul.f32 %v334_v31, %v1389_v59 }
  0x9e   :  { %v1442_v57 = vmul.f32 %v335_v17, %v1426_v45  ;;  %v1448_v23 = vadd.f32 %v232_v35, %v195_v44  ;;  %v311_v20 = vmul.f32 %v873_v53, %v1199_v13  ;;  %v214_v39 = vadd.f32 1.0, %v1424_v63 }
  0x9f   :  { %v405_v46 = vsub.f32 %v1153_v15, %v1239_v50  ;;  %v1461_v31 = vsel %vm297_vm10, %v869_v49, %v310_v62  ;;  %v204_v44 = vsel %vm1418_vm11, %v201_v16, %v198_v7  ;;  %v407_v13 = vsub.f32 %v1150_v12, %v1215_v18 }
  0xa0   :  { %v336_v17 = vmul.f32 %v1461_v31, %v1461_v31  ;;  %v209_v35 = vadd.f32 1.0, %v208_v6  ;;  %v217_v50 = vmul.f32 -0.5, %v1424_v63  ;;  %v458_v62 = vsub.f32 %v1290_v19, %v445_v56 }
  0xa1   :  { %v1413_v21 = vpop.permute.xlu1 %377  ;;  %v1415_v1 = vpop.permute.xlu0 %602  ;;  %v1478_v18 = vadd.f32 %v233_v41, %v204_v44  ;;  %v1482_v16 = vsel %vm298_vm12, %v873_v53, %v311_v20  ;;  %880 = vlog2.f32 %v214_v39  ;;  %v420_v6 = vmul.f32 %v407_v13, %v407_v13  ;;  %v1795_v20 = vld [vmem:[#allocation10_spill] sm:$0xff]  ;;  %v1809_v44 = vld [vmem:[#allocation11_spill] sm:$0xff] }
  0xa2   :  { %1789 = vst [vmem:[#allocation23_spill] sm:$0xff] %v1413_v21  ;;  %v406_v21 = vsub.f32 %v1182_v61, %v1294_v22  ;;  %v1792_v22 = vlaneseq  ;;  %v444_v61 = vmul.f32 %v1153_v15, %v1032_v42  ;;  %v446_v42 = vmul.f32 %v1150_v12, %v1026_v40 }
  0xa3   :  { %v418_v40 = vmul.f32 %v405_v46, %v405_v46  ;;  %v1495_v19 = vmul.f32 %v336_v17, %v1448_v23  ;;  %v218_v41 = vadd.f32 1.0, %v217_v50  ;;  %vm563_vm3 = vcmp.eq.s32.totalorder %v1107_v29, %v1795_v20 }
  0xa4   :  { %v1453_v36 = vshrl.u32 %v1792_v22, 7  ;;  %v877_v22 = vpop.eup %876  ;;  %v419_v15 = vmul.f32 %v406_v21, %v406_v21  ;;  %v457_v12 = vsub.f32 %v1255_v4, %v444_v61  ;;  %v210_v21 = vmul.f32 %v1338_v38, %v209_v35  ;;  %vm1505_vm4 = vmand %vm628_vm1, %vm563_vm3 }
  0xa5   :  { %v1444_v11 = vpop.permute.xlu1 %605  ;;  %v1446_v25 = vpop.permute.xlu0 %540  ;;  %v207_v53 = vmul.f32 0.6931472, %v877_v22  ;;  %v459_v56 = vsub.f32 %v1211_v28, %v446_v42  ;;  %v408_v46 = vsub.f32 %v1796_v8, %v1266_v33  ;;  %v447_v61 = vmul.f32 %v1796_v8, %v1037_v43  ;;  %v1807_v8 = vld [vmem:[#allocation5_spill] sm:$0xff] }
  0xa6   :  { %v471_v4 = vmul.f32 %v458_v62, %v419_v15  ;;  %v879_v34 = vpop.eup %878  ;;  %882 = vrcp.f32 %v214_v39  ;;  %v470_v35 = vmul.f32 %v457_v12, %v418_v40  ;;  %v409_v43 = vsub.f32 %v1298_v37, %v1312_v0  ;;  %v1801_v62 = vld [vmem:[#allocation12_spill] sm:$0xff]  ;;  %v1802_v12 = vld [vmem:[#allocation13_spill] sm:$0xff] }
  0xa7   :  { %v448_v50 = vmul.f32 %v1298_v37, %v1050_v51  ;;  %v1527_v22 = vmul.f32 %v1482_v16, %v1482_v16  ;;  %v1530_v42 = vmul.f32 %v1424_v63, %v218_v41  ;;  %v220_v39 = vand.u32 2147483647, %v1424_v63 }
  0xa8   :  { %v655_v33 = vsel %vm1490_vm2, %v471_v4, %v1332_v52  ;;  %v472_v15 = vmul.f32 %v459_v56, %v420_v6  ;;  %v654_v52 = vsel %vm1505_vm4, %v470_v35, %v1282_v54  ;;  %v213_v0 = vsel %vm1513_vm5, %v210_v21, %v207_v53  ;;  %v1805_v56 = vld [vmem:[#allocation17_spill] sm:$0xff]  ;;  %v1806_v4 = vld [vmem:[#allocation15_spill] sm:$0xff] }
  0xa9   :  { %v1474_v49 = vpop.permute.xlu1 %543  ;;  %v1476_v7 = vpop.permute.xlu0 %382  ;;  %v312_v51 = vmul.f32 %v879_v34, %v1338_v38  ;;  %v421_v37 = vmul.f32 %v408_v46, %v408_v46  ;;  %v460_v30 = vsub.f32 %v1801_v62, %v447_v61  ;;  %v750_v40 = vsel %vm748_vm13, %v655_v33, 0.0  ;;  %v1808_v46 = vld [vmem:[#allocation6_spill] sm:$0xff] }
  0xaa   :  { %vm565_vm7 = vcmp.eq.s32.totalorder %v1107_v29, %v1802_v12  ;;  %v422_v6 = vmul.f32 %v409_v43, %v409_v43  ;;  %v461_v54 = vsub.f32 %v1322_v48, %v448_v50  ;;  %vm631_vm9 = vcmp.eq.s32.totalorder %v1358_v10, 1  ;;  %v1818_v12 = vld [vmem:[#allocation16_spill] sm:$0xff] }
  0xab   :  { %vm1550_vm8 = vmand %vm630_vm6, %vm565_vm7  ;;  %vm566_vm10 = vcmp.eq.s32.totalorder %v1107_v29, %v1360_v55  ;;  %v881_v38 = vpop.eup %880  ;;  %v749_v21 = vsel %vm748_vm13, %v654_v52, 0.0  ;;  %v410_v20 = vsub.f32 %v1806_v4, %v1805_v56  ;;  %v449_v48 = vmul.f32 %v1806_v4, %v1807_v8  ;;  %v1822_v56 = vld [vmem:[#allocation22_spill] sm:$0xff] }
  0xac   :  { %vm632_vm11 = vcmp.eq.s32.totalorder %v1415_v1, 1  ;;  %v411_v47 = vsub.f32 %v1387_v32, %v1352_v5  ;;  %v450_v10 = vmul.f32 %v1387_v32, %v1808_v46  ;;  %v1569_v55 = vadd.f32 %v234_v26, %v213_v0  ;;  %vm1578_vm12 = vmand %vm631_vm9, %vm566_vm10  ;;  %v1812_v5 = vld [vmem:[#allocation23_spill] sm:$0xff]  ;;  %v1819_v1 = vld [vmem:[#allocation14_spill] sm:$0xff] }
  0xad   :  { %v1509_v17 = vpop.permute.xlu1 %387  ;;  %v1511_v13 = vpop.permute.xlu0 %608  ;;  %v1573_v61 = vsel %vm299_vm15, %v879_v34, %v312_v51  ;;  %v656_v28 = vsel %vm1550_vm8, %v472_v15, %v1809_v44  ;;  %vm567_vm14 = vcmp.eq.s32.totalorder %v1107_v29, %v1385_v60  ;;  %v412_v32 = vsub.f32 %v1812_v5, %v1397_v58  ;;  %v1813_v26 = vld [vmem:[#allocation7_spill] sm:$0xff] }
  0xae   :  { %v451_v33 = vmul.f32 %v1812_v5, %v1813_v26  ;;  %vm1588_vm15 = vcmp.lt.f32.partialorder %v220_v39, 0.0004427343  ;;  %v473_v15 = vmul.f32 %v460_v30, %v421_v37  ;;  %v751_v52 = vadd.f32 %v750_v40, %v749_v21  ;;  %vm1594_vm0 = vmand %vm632_vm11, %vm567_vm14  ;;  %v1820_v40 = vld [vmem:[#allocation19_spill] sm:$0xff]  ;;  %v1821_v21 = vld [vmem:[#allocation18_spill] sm:$0xff] }
  0xaf   :  { %v474_v0 = vmul.f32 %v461_v54, %v422_v6  ;;  %v1598_v60 = vmul.f32 0.6931472, %v881_v38  ;;  %v423_v62 = vmul.f32 %v410_v20, %v410_v20  ;;  %v462_v53 = vsub.f32 %v1818_v12, %v449_v48  ;;  %v1825_v48 = vld [vmem:[#allocation8_spill] sm:$0xff] }
  0xb0   :  { %v883_v58 = vpop.eup %882  ;;  %vm633_vm1 = vcmp.eq.s32.totalorder %v1444_v11, 1  ;;  %vm568_vm2 = vcmp.eq.s32.totalorder %v1107_v29, %v1446_v25  ;;  %vm300_vm3 = vcmp.ge.f32.partialorder %v1229_v27, 0.0  ;;  %v752_v39 = vsel %vm748_vm13, %v656_v28, 0.0 }
  0xb1   :  { %v1543_v9 = vpop.permute.xlu1 %611  ;;  %v1545_v41 = vpop.permute.xlu0 %546  ;;  %v657_v37 = vsel %vm1578_vm12, %v473_v15, %v1819_v1  ;;  %v424_v30 = vmul.f32 %v411_v47, %v411_v47  ;;  %v463_v6 = vsub.f32 %v1820_v40, %v450_v10  ;;  %v425_v54 = vmul.f32 %v412_v32, %v412_v32  ;;  %vm1616_vm4 = vmand %vm633_vm1, %vm568_vm2 }
  0xb2   :  { %v464_v38 = vsub.f32 %v1389_v59, %v451_v33  ;;  %v658_v11 = vsel %vm1594_vm0, %v474_v0, %v1821_v21  ;;  %v413_v25 = vsub.f32 %v1476_v7, %v1822_v56  ;;  %v452_v47 = vmul.f32 %v1476_v7, %v1825_v48 }
  0xb3   :  { %v414_v46 = vsub.f32 %v1509_v17, %v1461_v31  ;;  %v453_v59 = vmul.f32 %v1509_v17, %v1079_v2  ;;  %vm634_vm5 = vcmp.eq.s32.totalorder %v1511_v13, 1  ;;  %v475_v10 = vmul.f32 %v462_v53, %v423_v62  ;;  %v1826_v17 = vld [vmem:[#allocation20_spill] sm:$0xff] }
  0xb4   :  { %vm635_vm6 = vcmp.eq.s32.totalorder %v1543_v9, 1  ;;  %vm570_vm7 = vcmp.eq.s32.totalorder %v1107_v29, %v1545_v41  ;;  %v313_v44 = vmul.f32 %v883_v58, %v1424_v63  ;;  %v753_v28 = vadd.f32 %v752_v39, %v751_v52  ;;  %v1831_v41 = vld [vmem:[#allocation21_spill] sm:$0xff] }
  0xb5   :  { %v550_v43 = vpop.permute.xlu1 %549  ;;  %v393_v34 = vpop.permute.xlu0 %392  ;;  %v754_v35 = vsel %vm748_vm13, %v657_v37, 0.0  ;;  %v476_v7 = vmul.f32 %v463_v6, %v424_v30  ;;  %vm569_vm8 = vcmp.eq.s32.totalorder %v1107_v29, %v1474_v49  ;;  %v477_v31 = vmul.f32 %v464_v38, %v425_v54  ;;  %vm1649_vm10 = vmand %vm635_vm6, %vm570_vm7 }
  0xb6   :  { %v756_v2 = vsel %vm748_vm13, %v658_v11, 0.0  ;;  %v659_v13 = vsel %vm1616_vm4, %v475_v10, %v1826_v17  ;;  %v426_v5 = vmul.f32 %v413_v25, %v413_v25  ;;  %vm1638_vm9 = vmand %vm634_vm5, %vm569_vm8  ;;  %v465_v33 = vsub.f32 %v1426_v45, %v452_v47 }
  0xb7   :  { %v427_v15 = vmul.f32 %v414_v46, %v414_v46  ;;  %v466_v52 = vsub.f32 %v1448_v23, %v453_v59  ;;  %v415_v0 = vsub.f32 %v393_v34, %v1482_v16  ;;  %v454_v51 = vmul.f32 %v393_v34, %v1088_v14 }
  0xb8   :  { %v755_v45 = vadd.f32 %v754_v35, %v753_v28  ;;  %v758_v23 = vsel %vm748_vm13, %v659_v13, 0.0  ;;  %vm571_vm0 = vcmp.eq.s32.totalorder %v1107_v29, %v550_v43  ;;  %v222_v9 = vsel %vm1588_vm15, %v1530_v42, %v1598_v60 }
  0xb9   :  { %v398_v4 = vpop.permute.xlu1 %397  ;;  %v615_v20 = vpop.permute.xlu0 %614  ;;  %v660_v62 = vsel %vm1638_vm9, %v476_v7, %v1831_v41  ;;  %v661_v14 = vsel %vm1649_vm10, %v477_v31, %v1439_v3  ;;  %v441_v42 = vmul.f32 %v1527_v22, %v1478_v18  ;;  %v338_v60 = vmul.f32 %v1573_v61, %v1573_v61 }
  0xba   :  { %vm636_vm11 = vcmp.eq.s32.totalorder %v615_v20, 1  ;;  %v416_v16 = vsub.f32 %v398_v4, %v1573_v61  ;;  %v455_v34 = vmul.f32 %v398_v4, %v1100_v24  ;;  %v757_v50 = vadd.f32 %v756_v2, %v755_v45 }
  0xbb   :  { %vm1670_vm1 = vmand %vm636_vm11, %vm571_vm0  ;;  %v326_v24 = vsel %vm300_vm3, %v883_v58, %v313_v44  ;;  %v478_v39 = vmul.f32 %v465_v33, %v426_v5  ;;  %v479_v1 = vmul.f32 %v466_v52, %v427_v15  ;;  %v428_v37 = vmul.f32 %v415_v0, %v415_v0 }
  0xbc   :  { %v467_v30 = vsub.f32 %v1478_v18, %v454_v51  ;;  %v759_v40 = vadd.f32 %v758_v23, %v757_v50  ;;  %v760_v22 = vsel %vm748_vm13, %v660_v62, 0.0  ;;  %v762_v61 = vsel %vm748_vm13, %v661_v14, 0.0 }
  0xbd   :  { %v618_v63 = vpop.permute.xlu1 %617  ;;  %v553_v26 = vpop.permute.xlu0 %552  ;;  %v1836_v6 = vmax.f32 %v1229_v27, 0.0  ;;  %v429_v38 = vmul.f32 %v416_v16, %v416_v16  ;;  %v468_v21 = vsub.f32 %v1569_v55, %v455_v34  ;;  %v662_v58 = vsel %vm1670_vm1, %v478_v39, %v1442_v57 }
  0xbe   :  { %vm637_vm12 = vcmp.eq.s32.totalorder %v618_v63, 1  ;;  %vm572_vm14 = vcmp.eq.s32.totalorder %v1107_v29, %v553_v26  ;;  %v761_v20 = vadd.f32 %v760_v22, %v759_v40  ;;  %v480_v8 = vmul.f32 %v467_v30, %v428_v37 }
  0xbf   :  { %vm1681_vm15 = vmand %vm637_vm12, %vm572_vm14  ;;  %v248_v54 = vadd.f32 %v1836_v6, %v222_v9  ;;  %v442_v57 = vmul.f32 %v338_v60, %v1569_v55  ;;  %v764_v47 = vsel %vm748_vm13, %v662_v58, 0.0  ;;  %v339_v46 = vmul.f32 %v326_v24, %v326_v24 }
  0xc0   :  { %v663_v11 = vsel %vm1681_vm15, %v479_v1, %v1495_v19  ;;  %v681_v19 = vadd.s32 96, %v1453_v36  ;;  %v763_v59 = vadd.f32 %v762_v61, %v761_v20  ;;  %v481_v10 = vmul.f32 %v468_v21, %v429_v38 }
  0xc1   :  { %v556_v43 = vpop.permute.xlu1 %555  ;;  %v403_v53 = vpop.permute.xlu0 %402  ;;  %v766_v44 = vsel %vm748_vm13, %v663_v11, 0.0  ;;  %v443_v2 = vmul.f32 %v339_v46, %v248_v54  ;;  %vm784_vm12 = vcmask 0  }
  0xc2   :  { %vm573_vm2 = vcmp.eq.s32.totalorder %v1107_v29, %v556_v43  ;;  %v417_v25 = vsub.f32 %v403_v53, %v326_v24  ;;  %v456_v4 = vmul.f32 %v403_v53, %v1229_v27  ;;  %v765_v31 = vadd.f32 %v764_v47, %v763_v59 }
  0xc3   :  { %vm708_vm8 = vcmp.lt.s32.totalorder %v681_v19, 100 }
  0xc4   :  { %v430_v35 = vmul.f32 %v417_v25, %v417_v25  ;;  %v469_v7 = vsub.f32 %v248_v54, %v456_v4  ;;  %v767_v13 = vadd.f32 %v766_v44, %v765_v31 }
  0xc5   :  { %v559_v18 = vpop.permute.xlu1 %558  ;;  %v621_v56 = vpop.permute.xlu0 %620 }
  0xc6   :  { %vm638_vm3 = vcmp.eq.s32.totalorder %v621_v56, 1  ;;  %vm574_vm5 = vcmp.eq.s32.totalorder %v1107_v29, %v559_v18  ;;  %v482_v32 = vmul.f32 %v469_v7, %v430_v35 }
  0xc7   :  { %vm1701_vm4 = vmand %vm638_vm3, %vm573_vm2 }
  0xc8   :  { %v664_v27 = vsel %vm1701_vm4, %v480_v8, %v441_v42 }
  0xc9   :  { %v624_v28 = vpop.permute.xlu0 %623  ;;  %v562_v55 = vpop.permute.xlu1 %561  ;;  %v768_v17 = vsel %vm748_vm13, %v664_v27, 0.0 }
  0xca   :  { %vm639_vm6 = vcmp.eq.s32.totalorder %v624_v28, 1  ;;  %vm575_vm9 = vcmp.eq.s32.totalorder %v1107_v29, %v562_v55  ;;  %v769_v26 = vadd.f32 %v768_v17, %v767_v13 }
  0xcb   :  { %vm652_vm7 = vmand %vm639_vm6, %vm574_vm5 }
  0xcc   :  { %v665_v36 = vsel %vm652_vm7, %v481_v10, %v442_v57 }
  0xcd   :  { %v627_v5 = vpop.permute.xlu0 %626  ;;  %v770_v63 = vsel %vm748_vm13, %v665_v36, 0.0 }
  0xce   :  { %vm640_vm10 = vcmp.eq.s32.totalorder %v627_v5, 1  ;;  %v771_v52 = vadd.f32 %v770_v63, %v769_v26 }
  0xcf   :  { %vm653_vm11 = vmand %vm640_vm10, %vm575_vm9 }
  0xd0   :  { %v666_v33 = vsel %vm653_vm11, %v482_v32, %v443_v2 }
  0xd1   :  { %v747_v15 = vsel %vm708_vm8, %v666_v33, 0.0 }
  0xd2   :  { %v772_v49 = vsel %vm748_vm13, %v747_v15, 0.0 }
  0xd3   :  { %v773_v0 = vadd.f32 %v772_v49, %v771_v52 }
  0xd5   :  { %774 = vadd.xlane.f32.xlu1 %v773_v0 }
 0x162   :  { %v775_v51 = vpop.xlane.xlu1 %774 }
 0x163   :  { %v776_v45 = vrot.slane %v775_v51, 4 }
 0x165   :  { %v777_v23 = vadd.f32 %v776_v45, %v775_v51 }
 0x167   :  { %v778_v9 = vrot.slane %v777_v23, 2 }
 0x169   :  { %v779_v41 = vadd.f32 %v778_v9, %v777_v23 }
 0x16b   :  { %v780_v62 = vrot.slane %v779_v41, 1 }
 0x16d   :  { %v781_v14 = vadd.f32 %v780_v62, %v779_v41 }
 0x16f   :  { %800 = vpush %v781_v14 }
 0x1a0   :  { %s801_s8 = spop %800 }
 0x1a1   :  { %v783_v29 = vstv %s801_s8 }
 0x1a2   :  { %785 = vst.msk [vmem:[#allocation2] sm:$0x1] %vm784_vm12, %v783_v29 }
 0x1a3   :  { %895 = shalt.err (!%p892_p4)
}
 0x1a4   :  { %s896_s11 = scalar_lea.hbm %s1731_s3, 16 }
 0x1a5   :  { %p897_p5 = scmp.ne.s32.totalorder %s1731_s3, %s896_s11  ;;  %p900_p6 = scmp.lt.u32.totalorder %s896_s11, %s1731_s3 }
 0x1a7   :  { %p902_p7 = pnand %p900_p6, %p897_p5 }
 0x1a9   :  { %905 = shalt.err (!%p902_p7)
}
 0x1aa   :  { %795 = dma.vmem_to_hbm [thread:$0]  %s793_s7, 16, %s1731_s3, [#allocation3]  }
 0x1ab   :  { %906 = dma.done.wait [#allocation3], 16  }
 0x1ac   :  { %907 = vsyncadd [#allocation3], 4294967280 }
 0x1ad   :  { %799 = vsyncpa [#allocation3], 1 }

</bundles_post_ra>
